<compile_context>
chip_gen: v6e
topology: v6e:2x2x1
jax: 0.10.0
libtpu: 0.0.40
codegen_flags: <defaults>
</compile_context>

<pallas_src>
import functools
import math

import jax
import jax.numpy as jnp
from jax import lax
from jax.experimental import pallas as pl
from jax.experimental.pallas import tpu as pltpu

_MIB = 1024 * 1024


def mlp_critic_kernel(x_ref, w1_ref, b1_ref, w2_ref, b2_ref, w3_ref, b3_ref,
                      out_ref, *, act_dtype):
    """One batch tile of the 2-hidden-layer value MLP, batch along lanes.

    x_ref  : (TB, obs_dim) obs tile, natural layout, f32 (cast in-kernel)
    w1_ref : (H1, obs_dim) bf16 layer-1 weight (PyTorch (out, in) layout)
    b1_ref : (H1, 1)  f32
    w2_ref : (H2, H1) bf16 ; b2_ref : (H2, 1) f32
    w3_ref : (1, H2)  bf16 output weight stored as a row
    b3_ref : (1, 1)   f32
    out_ref: (1, TB)  f32 lane-dense value row for this batch tile
    """
    mm_dtype = w1_ref.dtype
    x = x_ref[...].astype(mm_dtype)                      # in-kernel f32->bf16

    # Hidden layer 1: contract obs_dim of both operands on the MXU -> (H1, TB).
    h1 = lax.dot_general(w1_ref[...], x,
                         dimension_numbers=(((1,), (1,)), ((), ())),
                         preferred_element_type=jnp.float32)
    # Bias + tanh in act_dtype (bf16 on v6e/v7x, f32 on v5e).
    h1 = jnp.tanh((h1 + b1_ref[...]).astype(act_dtype))

    # Hidden layer 2.
    h2 = jnp.dot(w2_ref[...], h1.astype(mm_dtype),
                 preferred_element_type=jnp.float32)
    h2 = jnp.tanh((h2 + b2_ref[...]).astype(act_dtype))

    # Width-1 output layer as an M=1 MXU matmul -> lane-dense (1, TB) row
    # (keeps the VPU/XLU path clear; no masked N=1 stores).
    v = jnp.dot(w3_ref[...], h2.astype(mm_dtype),
                preferred_element_type=jnp.float32)
    out_ref[...] = (v + b3_ref[...]).astype(out_ref.dtype)


def init_mlp_critic_params(key, obs_dim, hidden_sizes):
    """PyTorch-layout f32 params: weight (out, in), bias (out,), with
    nn.Linear's U(-1/sqrt(fan_in), +1/sqrt(fan_in)) init."""
    sizes = [obs_dim] + list(hidden_sizes) + [1]
    params = []
    for j in range(len(sizes) - 1):
        fan_in, fan_out = sizes[j], sizes[j + 1]
        key, wk, bk = jax.random.split(key, 3)
        bound = 1.0 / math.sqrt(fan_in)
        w = jax.random.uniform(wk, (fan_out, fan_in), jnp.float32, -bound, bound)
        b = jax.random.uniform(bk, (fan_out,), jnp.float32, -bound, bound)
        params += [w, b]
    return tuple(params)


def prepare_params(torch_params, compute_dtype=jnp.bfloat16):
    """One-time host-side prep: weights cast to the MXU dtype; biases kept in
    f32 as column vectors; the width-1 output weight stored as a (1, H2) row."""
    w1, b1, w2, b2, w3, b3 = torch_params
    return (
        w1.astype(compute_dtype), b1.reshape(-1, 1).astype(jnp.float32),
        w2.astype(compute_dtype), b2.reshape(-1, 1).astype(jnp.float32),
        w3.reshape(1, -1).astype(compute_dtype),        # (1, H2) row for M=1 MXU
        b3.reshape(1, 1).astype(jnp.float32),
    )


def _round_up(x, m):
    return ((x + m - 1) // m) * m


def _default_act_dtype():
    """bf16 bias/tanh only where the VPU/EUP have bf16 paths (v6e / v7x)."""
    try:
        kind = jax.devices()[0].device_kind.lower()
    except Exception:  # pragma: no cover
        kind = ""
    if ("v6" in kind) or ("v7" in kind):
        return jnp.bfloat16
    return jnp.float32


def _vmem_estimate_bytes(tb, obs_dim, h1_dim, h2_dim, mm_bytes=2):
    """Per-tile VMEM working set: double-buffered streamed obs/out tiles,
    resident params, plus ~5 live (H, TB) f32/bf16 intermediates."""
    hmax = max(h1_dim, h2_dim)
    return int(
        2 * tb * obs_dim * 4                               # obs tile x2 (f32)
        + tb * obs_dim * mm_bytes                          # in-kernel bf16 copy
        + 2 * tb * 4                                       # output tile x2
        + 2 * ((h1_dim * obs_dim + h2_dim * h1_dim + h2_dim) * mm_bytes
               + (h1_dim + h2_dim + 1) * 4)                # resident params
        + 5 * hmax * tb * 4)                               # live intermediates


@functools.partial(jax.jit, static_argnames=("block_batch", "act_dtype"))
def mlp_critic_forward(obs, params, *, block_batch=8192, act_dtype=None):
    """Pallas forward pass.  obs: (batch, obs_dim) f32 -> (batch,) f32 values."""
    if act_dtype is None:
        act_dtype = _default_act_dtype()

    w1, b1, w2, b2, w3, b3 = params
    batch, obs_dim = obs.shape
    h1_dim = w1.shape[0]
    h2_dim = w2.shape[0]

    assert block_batch % 128 == 0
    # Large lane-dense batch tile; small batches collapse to a single tile.
    # (On v7x, batches > block_batch naturally give a grid >= 2 so both
    #  TensorCores get tiles via the "parallel" dimension semantics.)
    tb = min(block_batch, _round_up(batch, 128))
    # Shrink the tile until the working set fits a v7x-safe budget.
    while tb > 128 and _vmem_estimate_bytes(tb, obs_dim, h1_dim, h2_dim) > 20 * _MIB:
        tb = max(128, tb // 2)

    grid = (pl.cdiv(batch, tb),)   # ragged last block handled by Pallas; its
                                   # garbage lanes are dropped by [:batch] below

    est = _vmem_estimate_bytes(tb, obs_dim, h1_dim, h2_dim)
    # Cap at 32 MiB so the same config stays under v7x's 64 MiB/TC VMEM.
    vmem_limit = int(min(32 * _MIB, max(8 * _MIB, (3 * est) // 2)))

    kernel = functools.partial(mlp_critic_kernel, act_dtype=act_dtype)

    out = pl.pallas_call(
        kernel,
        out_shape=jax.ShapeDtypeStruct((1, batch), jnp.float32),
        grid=grid,
        in_specs=[
            # Streamed obs tiles in natural (batch, obs_dim) layout.
            pl.BlockSpec((tb, obs_dim), lambda i: (i, 0)),
            # Weights / biases: constant index_maps -> VMEM-resident.
            pl.BlockSpec((h1_dim, obs_dim), lambda i: (0, 0)),
            pl.BlockSpec((h1_dim, 1), lambda i: (0, 0)),
            pl.BlockSpec((h2_dim, h1_dim), lambda i: (0, 0)),
            pl.BlockSpec((h2_dim, 1), lambda i: (0, 0)),
            pl.BlockSpec((1, h2_dim), lambda i: (0, 0)),
            pl.BlockSpec((1, 1), lambda i: (0, 0)),
        ],
        out_specs=pl.BlockSpec((1, tb), lambda i: (0, i)),
        compiler_params=pltpu.CompilerParams(
            dimension_semantics=("parallel",),   # shard batch tiles across TCs
            vmem_limit_bytes=vmem_limit,
        ),
    )(obs, w1, b1, w2, b2, w3, b3)

    # torch.squeeze(v, -1): lane-dense (1, batch) row -> (batch,)
    return out[0, :batch]


def mlp_critic_reference_f32(obs, torch_params):
    """Pure-f32 reference matching the PyTorch module exactly."""
    w1, b1, w2, b2, w3, b3 = torch_params
    h = jnp.tanh(obs @ w1.T + b1)
    h = jnp.tanh(h @ w2.T + b2)
    return (h @ w3.T + b3)[:, 0]


def mlp_critic_reference_mirrored(obs, kernel_params, act_dtype=jnp.float32):
    """Pure-JAX reference mirroring the kernel math (bf16 matmul inputs,
    f32 MXU accumulation, act_dtype bias/tanh)."""
    w1, b1, w2, b2, w3r, b3 = kernel_params
    x = obs.astype(w1.dtype)
    h1 = lax.dot_general(w1, x, dimension_numbers=(((1,), (1,)), ((), ())),
                         preferred_element_type=jnp.float32)
    h1 = jnp.tanh((h1 + b1).astype(act_dtype))
    h2 = jnp.dot(w2, h1.astype(w2.dtype), preferred_element_type=jnp.float32)
    h2 = jnp.tanh((h2 + b2).astype(act_dtype))
    v = jnp.dot(w3r, h2.astype(w3r.dtype), preferred_element_type=jnp.float32) + b3
    return v[0].astype(jnp.float32)


if __name__ == "__main__":
    key = jax.random.PRNGKey(0)
    key, obs_key, param_key = jax.random.split(key, 3)

    batch = 256           # lane-aligned small test batch (one exact tile)
    obs_dim = 16
    hidden_sizes = (32, 32)

    obs = jax.random.normal(obs_key, (batch, obs_dim), jnp.float32)
    torch_params = init_mlp_critic_params(param_key, obs_dim, hidden_sizes)
    kernel_params = prepare_params(torch_params, compute_dtype=jnp.bfloat16)

    act_dtype = _default_act_dtype()   # bf16 on v6e/v7x, f32 on v5e & older

    v_kernel = mlp_critic_forward(obs, kernel_params, act_dtype=act_dtype)
    v_kernel = jax.block_until_ready(v_kernel)
    assert v_kernel.shape == (batch,), v_kernel.shape

    # Check against a reference mirroring the kernel's bf16/f32 math exactly.
    v_mirror = mlp_critic_reference_mirrored(obs, kernel_params, act_dtype)
    assert jnp.allclose(v_kernel, v_mirror, atol=3e-2, rtol=3e-2), (
        "mismatch vs dtype-mirrored reference")

    # Loose sanity check against exact f32 PyTorch-equivalent math (difference
    # comes only from bf16 matmul inputs / activations).
    v_f32 = mlp_critic_reference_f32(obs, torch_params)
    assert jnp.allclose(v_kernel, v_f32, atol=2e-1, rtol=2e-1), (
        "mismatch vs f32 reference")

    print("KERNEL_OK")
</pallas_src>

<mosaic_0001>
module attributes {stable_mosaic.version = 11 : i64} {
  func.func @mlp_critic_kernel(%arg0: i32, %arg1: memref<256x16xf32, #tpu.memory_space<vmem>>, %arg2: memref<32x16xbf16, #tpu.memory_space<vmem>>, %arg3: memref<32x1xf32, #tpu.memory_space<vmem>>, %arg4: memref<32x32xbf16, #tpu.memory_space<vmem>>, %arg5: memref<32x1xf32, #tpu.memory_space<vmem>>, %arg6: memref<1x32xbf16, #tpu.memory_space<vmem>>, %arg7: memref<1x1xf32, #tpu.memory_space<vmem>>, %arg8: memref<1x256xf32, #tpu.memory_space<vmem>>) attributes {dimension_semantics = [#tpu.dimension_semantics<parallel>], iteration_bounds = array<i64: 1>, scalar_prefetch = 0 : i64, scratch_operands = 0 : i64, tpu.core_type = #tpu.core_type<tc>, window_params = [{transform_indices = @transform_0, window_bounds = array<i64: 256, 16>}, {pipeline_mode = #tpu.pipeline_mode<synchronous>, transform_indices = @transform_1, window_bounds = array<i64: 32, 16>}, {pipeline_mode = #tpu.pipeline_mode<synchronous>, transform_indices = @transform_2, window_bounds = array<i64: 32, 1>}, {pipeline_mode = #tpu.pipeline_mode<synchronous>, transform_indices = @transform_3, window_bounds = array<i64: 32, 32>}, {pipeline_mode = #tpu.pipeline_mode<synchronous>, transform_indices = @transform_4, window_bounds = array<i64: 32, 1>}, {pipeline_mode = #tpu.pipeline_mode<synchronous>, transform_indices = @transform_5, window_bounds = array<i64: 1, 32>}, {pipeline_mode = #tpu.pipeline_mode<synchronous>, transform_indices = @transform_6, window_bounds = array<i64: 1, 1>}, {transform_indices = @transform_7, window_bounds = array<i64: 1, 256>}]} {
    %c0 = arith.constant 0 : index
    %c0_0 = arith.constant 0 : index
    %0 = vector.load %arg1[%c0, %c0_0] : memref<256x16xf32, #tpu.memory_space<vmem>>, vector<256x16xf32>
    %1 = arith.truncf %0 : vector<256x16xf32> to vector<256x16xbf16>
    %c0_1 = arith.constant 0 : index
    %c0_2 = arith.constant 0 : index
    %2 = vector.load %arg2[%c0_1, %c0_2] : memref<32x16xbf16, #tpu.memory_space<vmem>>, vector<32x16xbf16>
    %cst = arith.constant dense<0.000000e+00> : vector<32x256xf32>
    %3 = tpu.matmul %2, %1, %cst {dimension_numbers = #tpu.dot_dimension_numbers<[1], [1], [0], [0], [0, 0, 1, 0], [], []>} : vector<32x16xbf16>, vector<256x16xbf16>, vector<32x256xf32> -> vector<32x256xf32>
    %c0_3 = arith.constant 0 : index
    %c0_4 = arith.constant 0 : index
    %4 = vector.load %arg3[%c0_3, %c0_4] : memref<32x1xf32, #tpu.memory_space<vmem>>, vector<32x1xf32>
    %5 = vector.broadcast %4 : vector<32x1xf32> to vector<32x256xf32>
    %6 = arith.addf %3, %5 : vector<32x256xf32>
    %7 = math.tanh %6 : vector<32x256xf32>
    %c0_5 = arith.constant 0 : index
    %c0_6 = arith.constant 0 : index
    %8 = vector.load %arg4[%c0_5, %c0_6] : memref<32x32xbf16, #tpu.memory_space<vmem>>, vector<32x32xbf16>
    %9 = arith.truncf %7 : vector<32x256xf32> to vector<32x256xbf16>
    %cst_7 = arith.constant dense<0.000000e+00> : vector<32x256xf32>
    %10 = tpu.matmul %8, %9, %cst_7 {dimension_numbers = #tpu.dot_dimension_numbers<[1], [0], [0], [1], [0, 0, 1, 1], [], []>} : vector<32x32xbf16>, vector<32x256xbf16>, vector<32x256xf32> -> vector<32x256xf32>
    %c0_8 = arith.constant 0 : index
    %c0_9 = arith.constant 0 : index
    %11 = vector.load %arg5[%c0_8, %c0_9] : memref<32x1xf32, #tpu.memory_space<vmem>>, vector<32x1xf32>
    %12 = vector.broadcast %11 : vector<32x1xf32> to vector<32x256xf32>
    %13 = arith.addf %10, %12 : vector<32x256xf32>
    %14 = math.tanh %13 : vector<32x256xf32>
    %c0_10 = arith.constant 0 : index
    %c0_11 = arith.constant 0 : index
    %15 = vector.load %arg6[%c0_10, %c0_11] : memref<1x32xbf16, #tpu.memory_space<vmem>>, vector<1x32xbf16>
    %16 = arith.truncf %14 : vector<32x256xf32> to vector<32x256xbf16>
    %cst_12 = arith.constant dense<0.000000e+00> : vector<1x256xf32>
    %17 = tpu.matmul %15, %16, %cst_12 {dimension_numbers = #tpu.dot_dimension_numbers<[1], [0], [0], [1], [0, 0, 1, 1], [], []>} : vector<1x32xbf16>, vector<32x256xbf16>, vector<1x256xf32> -> vector<1x256xf32>
    %c0_13 = arith.constant 0 : index
    %c0_14 = arith.constant 0 : index
    %18 = vector.load %arg7[%c0_13, %c0_14] : memref<1x1xf32, #tpu.memory_space<vmem>>, vector<1x1xf32>
    %19 = vector.broadcast %18 : vector<1x1xf32> to vector<1x256xf32>
    %20 = arith.addf %17, %19 : vector<1x256xf32>
    %c0_15 = arith.constant 0 : index
    %c0_16 = arith.constant 0 : index
    %21 = vector.load %arg8[%c0_15, %c0_16] : memref<1x256xf32, #tpu.memory_space<vmem>>, vector<1x256xf32>
    tpu.vector_store %arg8[%c0_15, %c0_16], %20 {strides = array<i32>} : memref<1x256xf32, #tpu.memory_space<vmem>>, vector<1x256xf32>,
    return
  }
  func.func @transform_0(%arg0: i32) -> (i32, i32) {
    %c0_i32 = arith.constant 0 : i32
    %c0_i32_0 = arith.constant 0 : i32
    return %arg0, %c0_i32 : i32, i32
  }
  func.func @transform_1(%arg0: i32) -> (i32, i32) {
    %c0_i32 = arith.constant 0 : i32
    %c0_i32_0 = arith.constant 0 : i32
    %c0_i32_1 = arith.constant 0 : i32
    return %c0_i32, %c0_i32_0 : i32, i32
  }
  func.func @transform_2(%arg0: i32) -> (i32, i32) {
    %c0_i32 = arith.constant 0 : i32
    %c0_i32_0 = arith.constant 0 : i32
    %c0_i32_1 = arith.constant 0 : i32
    return %c0_i32, %c0_i32_0 : i32, i32
  }
  func.func @transform_3(%arg0: i32) -> (i32, i32) {
    %c0_i32 = arith.constant 0 : i32
    %c0_i32_0 = arith.constant 0 : i32
    %c0_i32_1 = arith.constant 0 : i32
    return %c0_i32, %c0_i32_0 : i32, i32
  }
  func.func @transform_4(%arg0: i32) -> (i32, i32) {
    %c0_i32 = arith.constant 0 : i32
    %c0_i32_0 = arith.constant 0 : i32
    %c0_i32_1 = arith.constant 0 : i32
    return %c0_i32, %c0_i32_0 : i32, i32
  }
  func.func @transform_5(%arg0: i32) -> (i32, i32) {
    %c0_i32 = arith.constant 0 : i32
    %c0_i32_0 = arith.constant 0 : i32
    %c0_i32_1 = arith.constant 0 : i32
    return %c0_i32, %c0_i32_0 : i32, i32
  }
  func.func @transform_6(%arg0: i32) -> (i32, i32) {
    %c0_i32 = arith.constant 0 : i32
    %c0_i32_0 = arith.constant 0 : i32
    %c0_i32_1 = arith.constant 0 : i32
    return %c0_i32, %c0_i32_0 : i32, i32
  }
  func.func @transform_7(%arg0: i32) -> (i32, i32) {
    %c0_i32 = arith.constant 0 : i32
    %c0_i32_0 = arith.constant 0 : i32
    return %c0_i32, %arg0 : i32, i32
  }
}

</mosaic_0001>

<bundles_post_ra>
// kernel: mlp_critic_forward.1
= control target key start
LH: loop header
LB: loop body
LE: loop exit
PB: predicated region body
PF: predicated region fallthrough
CT: control target
= control target key end

     0   :  { %s754_s0 = inlined_call_operand.vmem [shape: f32[256,16], index: 0, kind: input, shape index: {}]   ;;  %s755_s1 = inlined_call_operand.vmem [shape: bf16[32,16], index: 1, kind: input, shape index: {}]   ;;  %s756_s2 = inlined_call_operand.vmem [shape: f32[32,1], index: 2, kind: input, shape index: {}]   ;;  %s757_s3 = inlined_call_operand.vmem [shape: bf16[32,32], index: 3, kind: input, shape index: {}]   ;;  %s758_s4 = inlined_call_operand.vmem [shape: f32[32,1], index: 4, kind: input, shape index: {}]   ;;  %s759_s5 = inlined_call_operand.vmem [shape: bf16[1,32], index: 5, kind: input, shape index: {}]   ;;  %s760_s6 = inlined_call_operand.<no memory space> [shape: f32[1,1], index: 6, kind: input, shape index: {}]   ;;  %s761_s7 = inlined_call_operand.hbm [shape: f32[1,256], index: 7, kind: output, shape index: {}]  }
   0x1   :  { %v12_v0 = vstv %s760_s6 }
   0x2   :  { %13 = vst [vmem:[#allocation2] sm:$0x1] %v12_v0 }
   0x3   :  { %v60_v1 = vld [vmem:[%s754_s0 + $0xf0] sm:$0xff]  ;;  %v61_v2 = vld [vmem:[%s754_s0 + $0xf8] sm:$0xff]  ;;  %vm116_vm0 = vcmask 130048   ;;  %v58_v6 = vld [vmem:[%s754_s0 + $0xe0] sm:$0xff]  ;;  %v538_v8 = vmov 0  }
   0x4   :  { %v44_v3 = vld [vmem:[%s754_s0 + $0x70] sm:$0xff]  ;;  %v77_v4 = vpack.c.bf16 %v61_v2, %v60_v1  ;;  %v45_v5 = vld [vmem:[%s754_s0 + $0x78] sm:$0xff]  ;;  %v59_v7 = vld [vmem:[%s754_s0 + $0xe8] sm:$0xff]  ;;  %478 = vset.pattern.permute.xlu0 %v538_v8  ;;  %479 = vset.pattern.permute.xlu1 %v538_v8 }
   0x5   :  { %v69_v9 = vpack.c.bf16 %v45_v5, %v44_v3  ;;  %v76_v10 = vpack.c.bf16 %v59_v7, %v58_v6  ;;  %313 = vmatprep.mubr.bf16.mxu1 %v538_v8  ;;  %v42_v11 = vld [vmem:[%s754_s0 + $0x60] sm:$0xff]  ;;  %v43_v12 = vld [vmem:[%s754_s0 + $0x68] sm:$0xff]  ;;  %v56_v15 = vld [vmem:[%s754_s0 + $0xd0] sm:$0xff] }
   0x6   :  { %467 = vmatprep.subr.msk.bf16.mxu0 %vm116_vm0, %v77_v4  ;;  %v68_v14 = vpack.c.bf16 %v43_v12, %v42_v11  ;;  %v57_v16 = vld [vmem:[%s754_s0 + $0xd8] sm:$0xff]  ;;  %v40_v19 = vld [vmem:[%s754_s0 + $0x50] sm:$0xff]  ;;  %v630_v21 = vld [vmem:[%s755_s1] sm:$0xff]  }
   0x7   :  { %v145_v13 = vsel %vm116_vm0, %v69_v9, 0  ;;  %v75_v18 = vpack.c.bf16 %v57_v16, %v56_v15  ;;  %v41_v20 = vld [vmem:[%s754_s0 + $0x58] sm:$0xff]  ;;  %v84_v22 = vld [vmem:[%s756_s2 + $0x10] sm:$0xff]  ;;  %463 = vmatprep.mubr.msk.bf16.mxu0 %vm116_vm0, %v630_v21  ;;  %v82_v23 = vld [vmem:[%s756_s2] sm:$0xff] }
   0x8   :  { %448 = vmatpush3.bf16.xpose.msra.mxu0 %v145_v13  ;;  %v142_v17 = vsel %vm116_vm0, %v68_v14, 0  ;;  %v67_v24 = vpack.c.bf16 %v41_v20, %v40_v19  ;;  %v54_v25 = vld [vmem:[%s754_s0 + $0xc0] sm:$0xff]  ;;  %v55_v26 = vld [vmem:[%s754_s0 + $0xc8] sm:$0xff]  ;;  %98 = vperm.xlu0 %478, %v84_v22   ;;  %v85_v27 = vld [vmem:[%s756_s2 + $0x18] sm:$0xff] }
   0x9   :  { %468 = vmatprep.subr.msk.bf16.mxu0 %vm116_vm0, %v76_v10  ;;  %88 = vperm.xlu1 %479, %v82_v23   ;;  %v83_v28 = vld [vmem:[%s756_s2 + $0x8] sm:$0xff] }
  0x10   :  { %450 = vmatpush3.bf16.xpose.msra.mxu0 %v142_v17 }
  0x11   :  { %469 = vmatprep.subr.msk.bf16.mxu0 %vm116_vm0, %v75_v18 }
  0x12   :  { %14 = vsyncpa [#allocation4], 0  ;;  %v139_v29 = vsel %vm116_vm0, %v67_v24, 0  ;;  %v74_v30 = vpack.c.bf16 %v55_v26, %v54_v25  ;;  %103 = vperm.xlu0 %478, %v85_v27   ;;  %v38_v31 = vld [vmem:[%s754_s0 + $0x40] sm:$0xff]  ;;  %v39_v32 = vld [vmem:[%s754_s0 + $0x48] sm:$0xff]  ;;  %93 = vperm.xlu1 %479, %v83_v28   ;;  %vm274_vm1 = vcmask 261120  }
  0x13   :  { %v242_v33 = vld [vmem:[%s758_s4 + $0x10] sm:$0xff]  ;;  %v243_v34 = vld [vmem:[%s758_s4 + $0x18] sm:$0xff]  ;;  %v66_v35 = vpack.c.bf16 %v39_v32, %v38_v31  ;;  %v240_v38 = vld [vmem:[%s758_s4] sm:$0xff]  ;;  %s540_s13 = smov [#allocation3]  }
  0x14   :  { %v52_v36 = vld [vmem:[%s754_s0 + $0xb0] sm:$0xff]  ;;  %v53_v37 = vld [vmem:[%s754_s0 + $0xb8] sm:$0xff]  ;;  %v241_v39 = vld [vmem:[%s758_s4 + $0x8] sm:$0xff] }
  0x15   :  { %v136_v40 = vsel %vm116_vm0, %v66_v35, 0  ;;  %v73_v41 = vpack.c.bf16 %v53_v37, %v52_v36  ;;  %v36_v42 = vld [vmem:[%s754_s0 + $0x30] sm:$0xff]  ;;  %v37_v43 = vld [vmem:[%s754_s0 + $0x38] sm:$0xff]  ;;  %v347_v44 = vld [vmem:[#allocation2] sm:$0x1] }
  0x16   :  { %256 = vperm.xlu0 %478, %v242_v33   ;;  %261 = vperm.xlu1 %479, %v243_v34   ;;  %v65_v45 = vpack.c.bf16 %v37_v43, %v36_v42  ;;  %v50_v46 = vld [vmem:[%s754_s0 + $0xa0] sm:$0xff]  ;;  %v51_v47 = vld [vmem:[%s754_s0 + $0xa8] sm:$0xff]  ;;  %v48_v53 = vld [vmem:[%s754_s0 + $0x90] sm:$0xff] }
  0x17   :  { %v72_v49 = vpack.c.bf16 %v51_v47, %v50_v46  ;;  %v34_v50 = vld [vmem:[%s754_s0 + $0x20] sm:$0xff]  ;;  %v35_v51 = vld [vmem:[%s754_s0 + $0x28] sm:$0xff]  ;;  %v49_v54 = vld [vmem:[%s754_s0 + $0x98] sm:$0xff] }
  0x18   :  { %452 = vmatpush3.bf16.xpose.msra.mxu0 %v139_v29  ;;  %v133_v48 = vsel %vm116_vm0, %v65_v45, 0  ;;  %v64_v52 = vpack.c.bf16 %v35_v51, %v34_v50  ;;  %v71_v56 = vpack.c.bf16 %v49_v54, %v48_v53  ;;  %v32_v57 = vld [vmem:[%s754_s0 + $0x10] sm:$0xff]  ;;  %v33_v58 = vld [vmem:[%s754_s0 + $0x18] sm:$0xff]  ;;  %v46_v60 = vld [vmem:[%s754_s0 + $0x80] sm:$0xff] }
  0x19   :  { %470 = vmatprep.subr.msk.bf16.mxu0 %vm116_vm0, %v74_v30  ;;  %v63_v59 = vpack.c.bf16 %v33_v58, %v32_v57  ;;  %v47_v61 = vld [vmem:[%s754_s0 + $0x88] sm:$0xff]  ;;  %v30_v0 = vld [vmem:[%s754_s0] sm:$0xff] }
  0x1a   :  { %246 = vperm.xlu0 %478, %v240_v38   ;;  %251 = vperm.xlu1 %479, %v241_v39   ;;  %v130_v55 = vsel %vm116_vm0, %v64_v52, 0  ;;  %v70_v63 = vpack.c.bf16 %v47_v61, %v46_v60  ;;  %v31_v1 = vld [vmem:[%s754_s0 + $0x8] sm:$0xff]  ;;  %v482_v38 = vld [vmem:[%s757_s3] sm:$0xff]  }
  0x1b   :  { %v127_v62 = vsel %vm116_vm0, %v63_v59, 0  ;;  %v62_v2 = vpack.c.bf16 %v31_v1, %v30_v0  ;;  %v481_v4 = vld [vmem:[%s755_s1 + $0x8] sm:$0xff]  }
  0x1c   :  { %v483_v39 = vld [vmem:[%s757_s3 + $0x8] sm:$0xff]  }
  0x1d   :  { %v124_v3 = vsel %vm116_vm0, %v62_v2, 0 }
  0x1e   :  { %350 = vperm.xlu0 %478, %v347_v44  }
  0x20   :  { %454 = vmatpush3.bf16.xpose.msra.mxu0 %v136_v40 }
  0x21   :  { %471 = vmatprep.subr.msk.bf16.mxu0 %vm116_vm0, %v73_v41 }
  0x28   :  { %456 = vmatpush3.bf16.xpose.msra.mxu0 %v133_v48 }
  0x29   :  { %472 = vmatprep.subr.msk.bf16.mxu0 %vm116_vm0, %v72_v49 }
  0x30   :  { %458 = vmatpush3.bf16.xpose.msra.mxu0 %v130_v55 }
  0x31   :  { %473 = vmatprep.subr.msk.bf16.mxu0 %vm116_vm0, %v71_v56 }
  0x38   :  { %460 = vmatpush3.bf16.xpose.msra.mxu0 %v127_v62 }
  0x39   :  { %474 = vmatprep.subr.msk.bf16.mxu0 %vm116_vm0, %v70_v63 }
  0x40   :  { %462 = vmatpush3.bf16.xpose.msra.mxu0 %v124_v3 }
  0x47   :  { %464 = vmatmul.mubr.msk.bf16.vlgmr.msra.gmra.mxu0 %vm116_vm0, %v630_v21 }
  0x48   :  { %465 = vmatprep.mubr.msk.bf16.mxu0 %vm116_vm0, %v481_v4 }
  0x4f   :  { %466 = vmatmul.mubr.msk.bf16.gmra.mxu0 %vm116_vm0, %v481_v4 }
  0x83   :  { %v99_v10 = vpop.permute.xlu0 %98 }
  0x84   :  { %v89_v7 = vpop.permute.xlu1 %88 }
  0x8d   :  { %v94_v13 = vpop.permute.xlu1 %93  ;;  %v104_v17 = vpop.permute.xlu0 %103 }
  0x91   :  { %v262_v42 = vpop.permute.xlu1 %261  ;;  %v257_v45 = vpop.permute.xlu0 %256 }
  0x95   :  { %v252_v47 = vpop.permute.xlu1 %251  ;;  %v247_v53 = vpop.permute.xlu0 %246 }
 0x107   :  { %v205_v5 = vpop.f32.mrf.mxu0 }
 0x108   :  { %v206_v25 = vadd.f32 %v205_v5, %v89_v7 }
 0x109   :  { %v207_v6 = vpop.f32.mrf.mxu0 }
 0x10a   :  { %v208_v22 = vadd.f32 %v207_v6, %v89_v7  ;;  %v342_v7 = vld [vmem:[%s759_s5] sm:$0x1]  ;;  %s430_s5 = sshll.u32 %s540_s13, 4  ;;  %s431_s5 = int_to_ptr.vmem [resolvable:$true] %s430_s5 }
 0x10b   :  { %v209_v9 = vpop.f32.mrf.mxu0  ;;  %s516_s14 = scalar_lea.vmem %s431_s5, 32  ;;  %p521_p1 = scmp.lt.s32.totalorder %s431_s5, %s431_s5 }
 0x10c   :  { %v210_v24 = vadd.f32 %v209_v9, %v94_v13  ;;  %v353_v9 = vlaneseq  ;;  %p517_p0 = scmp.ne.s32.totalorder %s431_s5, %s516_s14  ;;  %p522_p2 = scmp.lt.s32.totalorder %s516_s14, %s516_s14 }
 0x10d   :  { %v211_v11 = vpop.f32.mrf.mxu0 }
 0x10e   :  { %v212_v14 = vadd.f32 %v211_v11, %v94_v13  ;;  %v539_v11 = vmov 1966171168   ;;  %vm421_vm2 = vcmp.lt.s32.totalorder %v353_v9, 256  ;;  %p523_p3 = por %p522_p2, %p521_p1 }
 0x10f   :  { %v215_v12 = vpop.f32.mrf.mxu0 }
 0x110   :  { %484 = vtanh.f32 %v212_v14  ;;  %v216_v20 = vadd.f32 %v215_v12, %v99_v10  ;;  %v405_v12 = vunpack.c.l.s4 %v539_v11  ;;  %v351_v14 = vpop.permute.xlu0 %350  ;;  %p524_p4 = pnand %p523_p3, %p517_p0 }
 0x111   :  { %v217_v15 = vpop.f32.mrf.mxu0 }
 0x112   :  { %v218_v16 = vadd.f32 %v217_v15, %v99_v10  ;;  %v354_v10 = vshrl.u32 %v353_v9, 7  ;;  %v406_v15 = vunpack.c.0.s8 %v405_v12 }
 0x113   :  { %v219_v18 = vpop.f32.mrf.mxu0 }
 0x114   :  { %v220_v19 = vadd.f32 %v219_v18, %v104_v17  ;;  %486 = vtanh.f32 %v218_v16  ;;  %v355_v13 = vsub.s32 0, %v354_v10 }
 0x115   :  { %v221_v21 = vpop.f32.mrf.mxu0 }
 0x116   :  { %v222_v23 = vadd.f32 %v221_v21, %v104_v17  ;;  %488 = vtanh.f32 %v220_v19  ;;  %v356_v17 = vrot.slane %v351_v14, %v355_v13  ;;  %v409_v21 = vsub.s32 %v406_v15, %v354_v10 }
 0x118   :  { %490 = vtanh.f32 %v222_v23 }
 0x119   :  { %492 = vtanh.f32 %v216_v20 }
 0x11a   :  { %494 = vtanh.f32 %v208_v22 }
 0x11b   :  { %496 = vtanh.f32 %v210_v24 }
 0x11c   :  { %498 = vtanh.f32 %v206_v25 }
 0x11d   :  { %v485_v26 = vpop.eup %484 }
 0x121   :  { %v487_v27 = vpop.eup %486 }
 0x123   :  { %v489_v28 = vpop.eup %488 }
 0x125   :  { %v491_v29 = vpop.eup %490 }
 0x126   :  { %v493_v30 = vpop.eup %492  ;;  %v239_v31 = vpack.c.bf16 %v491_v29, %v487_v27 }
 0x127   :  { %v495_v32 = vpop.eup %494  ;;  %v238_v33 = vpack.c.bf16 %v489_v28, %v493_v30 }
 0x128   :  { %v497_v34 = vpop.eup %496  ;;  %293 = vmatprep.subr.bf16.mxu1 %v239_v31  ;;  %v237_v35 = vpack.c.bf16 %v485_v26, %v495_v32 }
 0x129   :  { %294 = vmatpush1.bf16.msra.mxu1 %v238_v33  ;;  %v499_v36 = vpop.eup %498 }
 0x12a   :  { %295 = vmatprep.subr.bf16.mxu1 %v237_v35  ;;  %v236_v37 = vpack.c.bf16 %v497_v34, %v499_v36 }
 0x12d   :  { %296 = vmatpush1.bf16.msra.mxu1 %v236_v37 }
 0x130   :  { %444 = vmatmul.mubr.msk.bf16.vlgmr.msra.gmra.mxu1 %vm274_vm1, %v482_v38 }
 0x131   :  { %323 = vmatprep.mubr.bf16.mxu1 %v538_v8 }
 0x138   :  { %445 = vmatmul.mubr.msk.bf16.gmra.mxu1 %vm274_vm1, %v483_v39 }
 0x139   :  { %392 = vmatprep.mubr.bf16.mxu1 %v538_v8 }
 0x1f0   :  { %v315_v40 = vpop.f32.mrf.mxu1 }
 0x1f1   :  { %v316_v58 = vadd.f32 %v315_v40, %v247_v53 }
 0x1f2   :  { %v317_v41 = vpop.f32.mrf.mxu1 }
 0x1f3   :  { %v318_v56 = vadd.f32 %v317_v41, %v247_v53 }
 0x1f4   :  { %v319_v43 = vpop.f32.mrf.mxu1 }
 0x1f5   :  { %v320_v57 = vadd.f32 %v319_v43, %v252_v47 }
 0x1f6   :  { %v321_v44 = vpop.f32.mrf.mxu1 }
 0x1f7   :  { %v322_v48 = vadd.f32 %v321_v44, %v252_v47 }
 0x1f8   :  { %v325_v46 = vpop.f32.mrf.mxu1 }
 0x1f9   :  { %500 = vtanh.f32 %v322_v48  ;;  %v326_v54 = vadd.f32 %v325_v46, %v257_v45 }
 0x1fa   :  { %v327_v49 = vpop.f32.mrf.mxu1 }
 0x1fb   :  { %v328_v50 = vadd.f32 %v327_v49, %v257_v45 }
 0x1fc   :  { %v329_v51 = vpop.f32.mrf.mxu1 }
 0x1fd   :  { %v330_v52 = vadd.f32 %v329_v51, %v262_v42  ;;  %502 = vtanh.f32 %v328_v50 }
 0x1fe   :  { %v331_v55 = vpop.f32.mrf.mxu1 }
 0x1ff   :  { %v332_v8 = vadd.f32 %v331_v55, %v262_v42  ;;  %504 = vtanh.f32 %v330_v52 }
 0x201   :  { %506 = vtanh.f32 %v332_v8 }
 0x202   :  { %508 = vtanh.f32 %v326_v54 }
 0x203   :  { %510 = vtanh.f32 %v318_v56 }
 0x204   :  { %512 = vtanh.f32 %v320_v57 }
 0x205   :  { %514 = vtanh.f32 %v316_v58 }
 0x206   :  { %v501_v59 = vpop.eup %500 }
 0x20a   :  { %v503_v60 = vpop.eup %502 }
 0x20c   :  { %v505_v61 = vpop.eup %504 }
 0x20e   :  { %v507_v62 = vpop.eup %506 }
 0x20f   :  { %v509_v63 = vpop.eup %508  ;;  %v346_v0 = vpack.c.bf16 %v507_v62, %v503_v60 }
 0x210   :  { %v511_v1 = vpop.eup %510  ;;  %v345_v2 = vpack.c.bf16 %v505_v61, %v509_v63 }
 0x211   :  { %v513_v3 = vpop.eup %512  ;;  %372 = vmatprep.subr.bf16.mxu1 %v346_v0  ;;  %v344_v4 = vpack.c.bf16 %v501_v59, %v511_v1 }
 0x212   :  { %373 = vmatpush1.bf16.msra.mxu1 %v345_v2  ;;  %v515_v5 = vpop.eup %514 }
 0x213   :  { %374 = vmatprep.subr.bf16.mxu1 %v344_v4  ;;  %v343_v6 = vpack.c.bf16 %v513_v3, %v515_v5 }
 0x216   :  { %375 = vmatpush1.bf16.msra.mxu1 %v343_v6 }
 0x219   :  { %446 = vmatmul.mubr.msk.bf16.vlgmr.msra.gmra.mxu1 %vm274_vm1, %v342_v7 }
 0x2d9   :  { %v394_v16 = vpop.f32.mrf.mxu1 }
 0x2da   :  { %v395_v19 = vadd.f32 %v394_v16, %v356_v17 }
 0x2db   :  { %v396_v18 = vpop.f32.mrf.mxu1 }
 0x2dc   :  { %v397_v20 = vadd.f32 %v396_v18, %v356_v17 }
 0x2dd   :  { %v398_v22 = vpop.f32.mrf.mxu1 }
 0x2de   :  { %v403_v23 = vcombine.low %v395_v19, %v397_v20 }
 0x2df   :  { %v399_v24 = vpop.f32.mrf.mxu1 }
 0x2e0   :  { %v410_v25 = vrot.slane %v403_v23, %v409_v21 }
 0x2e2   :  { %v417_v26 = vrot.slane %v410_v25, %v409_v21 }
 0x2e4   :  { %423 = vst.msk [vmem:[#allocation3] sm:$0x3] %vm421_vm2, %v417_v26 }
 0x2e5   :  { %527 = shalt.err (!%p524_p4)
}
 0x2e6   :  { %433 = dma.vmem_to_hbm [thread:$0]  %s431_s5, 32, %s761_s7, [#allocation4]  }
 0x2e7   :  { %536 = dma.done.wait [#allocation4], 32  }
 0x2e8   :  { %537 = vsyncadd [#allocation4], 4294967264 }
 0x2e9   :  { %437 = vsyncpa [#allocation4], 1 }

</bundles_post_ra>
